<compile_context>
chip_gen: v5e
topology: v5e:2x2
jax: 0.10.0
libtpu: 0.0.40
codegen_flags: <defaults>
</compile_context>

<pallas_src>
import jax
import jax.numpy as jnp
from jax.experimental import pallas as pl
from jax.experimental.pallas import tpu as pltpu

C_OUT = 3                                 # Conv2d(1, 3, 1, 1)
_F32_BYTES = 4
_VMEM_BUDGET_BYTES = 24 * 1024 * 1024     # double-buffered (input + 3-ch output) tile budget
_VMEM_LIMIT_BYTES = 48 * 1024 * 1024      # explicit scoped-VMEM limit (< v7x 64 MiB physical)
_MAX_LANE = 4096                          # cap on the lane-dense inner dim
_SUBLANE_PAD_FACTOR = 8                   # conservative padding factor for (..,1,TILE_P) tiles


def _conv1x1_kernel(w_ref, b_ref, x_ref, o_ref):
    """1x1 conv, C_in=1 -> C_out=3 (elementwise scale + bias per channel).

    w_ref: SMEM (3,)                      per-output-channel weight (C_in == k == 1)
    b_ref: SMEM (3,)                      bias
    x_ref: VMEM (1, rows, lane)           lane-dense tile of one image plane
    o_ref: VMEM (1, 3, rows, lane)        same tile for each of the 3 output channels (NCHW)
    """
    x = x_ref[0]                          # load the tile once: (rows, lane)
    for c in range(C_OUT):                # static unroll over the 3 output channels
        o_ref[0, c, :, :] = (x * w_ref[c] + b_ref[c]).astype(o_ref.dtype)


def _round_up(v, m):
    return -(-v // m) * m


def _choose_lane(p):
    """Largest multiple-of-128 divisor of p = H*W (capped), or None if p % 128 != 0."""
    if p % 128 != 0:
        return None
    cand = (min(p, _MAX_LANE) // 128) * 128
    while cand >= 128:
        if p % cand == 0:
            return cand
        cand -= 128
    return None


def _budget_tile(extent, bytes_per_unit, granule):
    """Largest tile keeping the double-buffered footprint under budget; multiple of
    `granule` unless it covers the full extent."""
    t = max(1, _VMEM_BUDGET_BYTES // bytes_per_unit)
    if t >= extent:
        return extent
    return max(granule, (t // granule) * granule)


def _ensure_two_blocks(extent, tile, granule, n_batch):
    """v7x megacore: for single-image inputs make sure the tiled axis yields >= 2 blocks
    so both TensorCores get work (kept a granule multiple to satisfy layout rules)."""
    if n_batch == 1 and tile >= extent and extent >= 2 * granule:
        tile = _round_up(-(-extent // 2), granule)
    return tile


def conv1x1_net_top(x_nchw, weight, bias, out_dtype=None):
    """x_nchw: (N, 1, H, W); weight: (3, 1, 1, 1); bias: (3,). Returns (N, 3, H, W).

    out_dtype: keep None (input dtype, f32) to match nn.Conv2d exactly; pass jnp.bfloat16
    only if the downstream UNet consumes bf16 (halves the dominant HBM write traffic).
    """
    n, c_in, h, w = x_nchw.shape
    assert c_in == 1
    out_dtype = x_nchw.dtype if out_dtype is None else out_dtype
    p = h * w

    w_vec = weight.reshape(C_OUT).astype(x_nchw.dtype)   # C_in = k = 1 -> just 3 scalars
    b_vec = bias.reshape(C_OUT).astype(x_nchw.dtype)

    lane = _choose_lane(p)
    if lane is not None:
        # Lane-dense slab: each contiguous (H, W) plane viewed as (R, LANE), LANE % 128 == 0.
        r = p // lane
        per_row = 2 * (1 + C_OUT) * lane * _F32_BYTES        # double-buffered bytes per row
        tile_r = _budget_tile(r, per_row, 8)
        tile_r = _ensure_two_blocks(r, tile_r, 8, n)
        x_view = x_nchw.reshape(n, r, lane)                  # free reshape, same memory order
        out_shape = (n, C_OUT, r, lane)
        grid = (n, pl.cdiv(r, tile_r))
        in_spec = pl.BlockSpec((1, tile_r, lane), lambda ni, j: (ni, j, 0))
        out_spec = pl.BlockSpec((1, C_OUT, tile_r, lane), lambda ni, j: (ni, 0, j, 0))
    else:
        # Flattened-plane fallback (H*W not a multiple of 128): tile along P with TILE_P a
        # multiple of 128 so only the final tail tile gets masked stores (instead of every
        # row being a narrow masked vst when W < 128).
        per_elem = 2 * (1 + C_OUT) * _F32_BYTES * _SUBLANE_PAD_FACTOR
        tile_p = _budget_tile(p, per_elem, 128)
        tile_p = _ensure_two_blocks(p, tile_p, 128, n)
        x_view = x_nchw.reshape(n, 1, p)                     # free reshape
        out_shape = (n, C_OUT, 1, p)
        grid = (n, pl.cdiv(p, tile_p))
        in_spec = pl.BlockSpec((1, 1, tile_p), lambda ni, j: (ni, 0, j))
        out_spec = pl.BlockSpec((1, C_OUT, 1, tile_p), lambda ni, j: (ni, 0, 0, j))

    out = pl.pallas_call(
        _conv1x1_kernel,
        out_shape=jax.ShapeDtypeStruct(out_shape, out_dtype),
        grid_spec=pltpu.PrefetchScalarGridSpec(
            num_scalar_prefetch=0,
            grid=grid,                                       # cdiv grid: tail tiles masked
            in_specs=[
                pl.BlockSpec(memory_space=pltpu.SMEM),       # weight (3,)
                pl.BlockSpec(memory_space=pltpu.SMEM),       # bias   (3,)
                in_spec,                                     # x tile
            ],
            out_specs=out_spec,
        ),
        compiler_params=pltpu.CompilerParams(
            dimension_semantics=("parallel", "parallel"),    # both axes shardable on v7x
            vmem_limit_bytes=_VMEM_LIMIT_BYTES),
    )(w_vec, b_vec, x_view)

    # Back to (N, 3, H, W): free reshape, output already in NCHW memory order.
    return out.reshape(n, C_OUT, h, w)


def module_forward(x_nchw, weight, bias, out_dtype=None):
    x = conv1x1_net_top(x_nchw, weight, bias, out_dtype=out_dtype)
    # TODO(synk): x = DenseUnet_2d_dual(x) -- external model definition not available.
    return x


if __name__ == "__main__":
    key = jax.random.PRNGKey(0)
    kx, kw, kb = jax.random.split(key, 3)

    # Small shapes consistent with the module: N=2, C_in=1, H=16, W=16.
    x = jax.random.normal(kx, (2, 1, 16, 16), dtype=jnp.float32)
    weight = jax.random.normal(kw, (3, 1, 1, 1), dtype=jnp.float32) * 0.5
    bias = jax.random.normal(kb, (3,), dtype=jnp.float32) * 0.1

    out = jax.block_until_ready(module_forward(x, weight, bias))
    ref = x * weight.reshape(1, 3, 1, 1) + bias.reshape(1, 3, 1, 1)
    assert out.shape == (2, 3, 16, 16)
    assert jnp.allclose(out, ref, atol=1e-6, rtol=1e-6)

    # Narrow-W plane (H*W % 128 != 0): exercises the flattened-plane lane-dense fallback.
    x2 = jax.random.normal(kx, (3, 1, 20, 12), dtype=jnp.float32)
    out2 = jax.block_until_ready(module_forward(x2, weight, bias))
    ref2 = x2 * weight.reshape(1, 3, 1, 1) + bias.reshape(1, 3, 1, 1)
    assert out2.shape == (3, 3, 20, 12)
    assert jnp.allclose(out2, ref2, atol=1e-6, rtol=1e-6)

    # N == 1: exercises the >=2-block split so both v7x TensorCores get work.
    x3 = jax.random.normal(kx, (1, 1, 512, 256), dtype=jnp.float32)
    out3 = jax.block_until_ready(module_forward(x3, weight, bias))
    ref3 = x3 * weight.reshape(1, 3, 1, 1) + bias.reshape(1, 3, 1, 1)
    assert out3.shape == (1, 3, 512, 256)
    assert jnp.allclose(out3, ref3, atol=1e-6, rtol=1e-6)

    # Optional bf16 output path (for a bf16 downstream UNet); looser tolerance.
    out_bf16 = jax.block_until_ready(module_forward(x, weight, bias, out_dtype=jnp.bfloat16))
    assert out_bf16.dtype == jnp.bfloat16
    assert jnp.allclose(out_bf16.astype(jnp.float32), ref, atol=5e-2, rtol=5e-2)

    print("KERNEL_OK")
</pallas_src>

<mosaic_0001>
module attributes {stable_mosaic.version = 11 : i64} {
  func.func @_conv1x1_kernel(%arg0: i32, %arg1: i32, %arg2: memref<3xf32, #tpu.memory_space<smem>>, %arg3: memref<3xf32, #tpu.memory_space<smem>>, %arg4: memref<1x1x256xf32, #tpu.memory_space<vmem>>, %arg5: memref<1x3x1x256xf32, #tpu.memory_space<vmem>>) attributes {dimension_semantics = [#tpu.dimension_semantics<parallel>, #tpu.dimension_semantics<parallel>], iteration_bounds = array<i64: 2, 1>, scalar_prefetch = 0 : i64, scratch_operands = 0 : i64, tpu.core_type = #tpu.core_type<tc>, window_params = [{transform_indices = @transform_0, window_bounds = array<i64: 3>}, {transform_indices = @transform_1, window_bounds = array<i64: 3>}, {transform_indices = @transform_2, window_bounds = array<i64: 1, 1, 256>}, {transform_indices = @transform_3, window_bounds = array<i64: 1, 3, 1, 256>}]} {
    %c0 = arith.constant 0 : index
    %c0_0 = arith.constant 0 : index
    %c0_1 = arith.constant 0 : index
    %0 = vector.load %arg4[%c0, %c0_0, %c0_1] : memref<1x1x256xf32, #tpu.memory_space<vmem>>, vector<1x1x256xf32>
    %1 = vector.shape_cast %0 : vector<1x1x256xf32> to vector<1x256xf32>
    %c0_2 = arith.constant 0 : index
    %2 = memref.load %arg2[%c0_2] : memref<3xf32, #tpu.memory_space<smem>>
    %3 = vector.broadcast %2 : f32 to vector<1x256xf32>
    %4 = arith.mulf %1, %3 : vector<1x256xf32>
    %c0_3 = arith.constant 0 : index
    %5 = memref.load %arg3[%c0_3] : memref<3xf32, #tpu.memory_space<smem>>
    %6 = vector.broadcast %5 : f32 to vector<1x256xf32>
    %7 = arith.addf %4, %6 : vector<1x256xf32>
    %c0_4 = arith.constant 0 : index
    %c0_5 = arith.constant 0 : index
    %c0_6 = arith.constant 0 : index
    %c0_7 = arith.constant 0 : index
    %8 = vector.load %arg5[%c0_4, %c0_5, %c0_6, %c0_7] : memref<1x3x1x256xf32, #tpu.memory_space<vmem>>, vector<1x1x1x256xf32>
    %9 = vector.shape_cast %8 : vector<1x1x1x256xf32> to vector<1x256xf32>
    %10 = vector.shape_cast %7 : vector<1x256xf32> to vector<1x1x1x256xf32>
    tpu.vector_store %arg5[%c0_4, %c0_5, %c0_6, %c0_7], %10 {strides = array<i32>} : memref<1x3x1x256xf32, #tpu.memory_space<vmem>>, vector<1x1x1x256xf32>,
    %c1 = arith.constant 1 : index
    %11 = memref.load %arg2[%c1] : memref<3xf32, #tpu.memory_space<smem>>
    %12 = vector.broadcast %11 : f32 to vector<1x256xf32>
    %13 = arith.mulf %1, %12 : vector<1x256xf32>
    %c1_8 = arith.constant 1 : index
    %14 = memref.load %arg3[%c1_8] : memref<3xf32, #tpu.memory_space<smem>>
    %15 = vector.broadcast %14 : f32 to vector<1x256xf32>
    %16 = arith.addf %13, %15 : vector<1x256xf32>
    %c0_9 = arith.constant 0 : index
    %c1_10 = arith.constant 1 : index
    %c0_11 = arith.constant 0 : index
    %c0_12 = arith.constant 0 : index
    %17 = vector.load %arg5[%c0_9, %c1_10, %c0_11, %c0_12] : memref<1x3x1x256xf32, #tpu.memory_space<vmem>>, vector<1x1x1x256xf32>
    %18 = vector.shape_cast %17 : vector<1x1x1x256xf32> to vector<1x256xf32>
    %19 = vector.shape_cast %16 : vector<1x256xf32> to vector<1x1x1x256xf32>
    tpu.vector_store %arg5[%c0_9, %c1_10, %c0_11, %c0_12], %19 {strides = array<i32>} : memref<1x3x1x256xf32, #tpu.memory_space<vmem>>, vector<1x1x1x256xf32>,
    %c2 = arith.constant 2 : index
    %20 = memref.load %arg2[%c2] : memref<3xf32, #tpu.memory_space<smem>>
    %21 = vector.broadcast %20 : f32 to vector<1x256xf32>
    %22 = arith.mulf %1, %21 : vector<1x256xf32>
    %c2_13 = arith.constant 2 : index
    %23 = memref.load %arg3[%c2_13] : memref<3xf32, #tpu.memory_space<smem>>
    %24 = vector.broadcast %23 : f32 to vector<1x256xf32>
    %25 = arith.addf %22, %24 : vector<1x256xf32>
    %c0_14 = arith.constant 0 : index
    %c2_15 = arith.constant 2 : index
    %c0_16 = arith.constant 0 : index
    %c0_17 = arith.constant 0 : index
    %26 = vector.load %arg5[%c0_14, %c2_15, %c0_16, %c0_17] : memref<1x3x1x256xf32, #tpu.memory_space<vmem>>, vector<1x1x1x256xf32>
    %27 = vector.shape_cast %26 : vector<1x1x1x256xf32> to vector<1x256xf32>
    %28 = vector.shape_cast %25 : vector<1x256xf32> to vector<1x1x1x256xf32>
    tpu.vector_store %arg5[%c0_14, %c2_15, %c0_16, %c0_17], %28 {strides = array<i32>} : memref<1x3x1x256xf32, #tpu.memory_space<vmem>>, vector<1x1x1x256xf32>,
    return
  }
  func.func @transform_0(%arg0: i32, %arg1: i32) -> i32 {
    %c0_i32 = arith.constant 0 : i32
    %c0_i32_0 = arith.constant 0 : i32
    return %c0_i32 : i32
  }
  func.func @transform_1(%arg0: i32, %arg1: i32) -> i32 {
    %c0_i32 = arith.constant 0 : i32
    %c0_i32_0 = arith.constant 0 : i32
    return %c0_i32 : i32
  }
  func.func @transform_2(%arg0: i32, %arg1: i32) -> (i32, i32, i32) {
    %c0_i32 = arith.constant 0 : i32
    %c0_i32_0 = arith.constant 0 : i32
    return %arg0, %arg1, %c0_i32 : i32, i32, i32
  }
  func.func @transform_3(%arg0: i32, %arg1: i32) -> (i32, i32, i32, i32) {
    %c0_i32 = arith.constant 0 : i32
    %c0_i32_0 = arith.constant 0 : i32
    %c0_i32_1 = arith.constant 0 : i32
    return %arg0, %c0_i32, %arg1, %c0_i32_0 : i32, i32, i32, i32
  }
}

</mosaic_0001>

<bundles_post_ra>
// kernel: tpu_custom_call.1
= control target key start
LH: loop header
LB: loop body
LE: loop exit
PB: predicated region body
PF: predicated region fallthrough
CT: control target
= control target key end

     0   :  { %8 = vsyncpa [#allocation5], 0  ;;  %s825_s0 = inlined_call_operand.hbm [shape: f32[3], index: 0, kind: input, shape index: {}]   ;;  %s826_s1 = inlined_call_operand.hbm [shape: f32[3], index: 1, kind: input, shape index: {}]   ;;  %s827_s2 = inlined_call_operand.hbm [shape: f32[2,1,256], index: 2, kind: input, shape index: {}]   ;;  %s828_s3 = inlined_call_operand.hbm [shape: f32[2,3,1,256], index: 3, kind: output, shape index: {}]  }
   0x1   :  { %9 = vsyncpa [#allocation7], 0 }
   0x2   :  { %10 = vsyncpa [#allocation3], 0 }
   0x3   :  { %12 = vsyncpa [#allocation3 + $0x1], 0 }
   0x4   :  { %13 = vsyncpa [#allocation4], 0 }
   0x5   :  { %15 = vsyncpa [#allocation4 + $0x1], 0  ;;  %s668_s12 = smov 0   ;;  %s670_s13 = smov 0  }
   0x6   :  { %s672_s14 = smov 0   ;;  %s674_s15 = smov 0  }
   0x7   :  { %s676_s16 = smov 0   ;;  %s678_s17 = smov 0  }
   0x8 LB: > { %s385_s18 = sadd.s32 4294967295, %s642_s17   ;;  %s386_s19 = sadd.s32 4294967294, %s642_s17   ;;  %s642_s17 = sphi %s678_s17, %s21_s17   ;;  %s638_s16 = sphi %s676_s16, %s840_s16   ;;  %s634_s15 = sphi %s674_s15, %s839_s15   ;;  %s630_s14 = sphi %s672_s14, %s838_s14   ;;  %s626_s13 = sphi %s670_s13, %s837_s13   ;;  %s622_s12 = sphi %s668_s12, %s836_s12  }
   0x9   : > { %p97_p0 = scmp.ne.s32.totalorder %s626_s13, %s622_s12  ;;  %p702_p1 = scmp.eq.s32.totalorder %s385_s18, 0 }
   0xa   : > { %p129_p2 = scmp.eq.s32.totalorder %s386_s19, 1  ;;  %p387_p4 = scmp.ge.s32.totalorder %s642_s17, 1 }
   0xb   : > { %p708_p3 = por %p702_p1, %p97_p0  ;;  %p136_p6 = scmp.lt.s32.totalorder %s642_s17, 3 }
   0xc   : > { %p713_p5 = por %p129_p2, %p97_p0  ;;  %s148_s25 = sshll.u32 %s825_s0, 4  ;;  %s149_s25 = int_to_ptr.hbm [resolvable:$true] %s148_s25 }
   0xd   : > { %p721_p7 = pnand %p387_p4, %p136_p6  ;;  %p390_p8 = scmp.ge.s32.totalorder %s642_s17, 2 }
   0xe   : > { %s158_s29 = sshll.u32 %s826_s1, 4  ;;  %s644_s30 = smov [#allocation2]   ;;  %s159_s29 = int_to_ptr.hbm [resolvable:$true] %s158_s29 }
   0xf   : > { %p419_p9 = pneg %p721_p7  ;;  %s645_s4 = smov [#allocation6]  }
  0x10   : > { %p123_p11 = scmp.eq.s32.totalorder %s385_s18, 1  ;;  %s33_s5 = sadd.s32 1, %s638_s16 }
  0x11   : > { %p420_p10 = pnand %p419_p9, %p702_p1  ;;  %p35_p12 = scmp.ge.s32.totalorder %s33_s5, 2 }
  0x12   : > { %s84_s6 = sadd.s32 1, %s630_s14  ;;  %p91_p13 = scmp.ne.s32.totalorder %s630_s14, %s626_s13 }
  0x13   : > { %422 = dma.hbm_to_smem (!%p420_p10), %s149_s25, 16, %s644_s30, [#allocation5]  }
  0x14   : > { %425 = dma.hbm_to_smem (!%p420_p10), %s159_s29, 16, %s645_s4, [#allocation7]  }
  0x15   : > { %p92_p0 = scmp.eq.s32.totalorder %s642_s17, 0  ;;  %s842_s5 = smov (%p35_p12, %s33_s5), 0 }
  0x16   : > { %p740_p2 = por %p123_p11, %p91_p13  ;;  %p436_p4 = scmp.lt.s32.totalorder %s642_s17, 2 }
  0x17   : > { %s79_s8 = ssub.s32 %s638_s16, %s842_s5  ;;  %s169_s9 = sand.u32 1, %s630_s14  }
  0x18   : > { %p82_p6 = scmp.eq.s32.totalorder %s79_s8, 0  ;;  %p93_p9 = por %p92_p0, %p91_p13 }
  0x19   : > { %s391_s10 = sshll.u32 %s169_s9, 1  ;;  %s392_s11 = sshll.u32 %s638_s16, 1 }
  0x1a   : > { %s750_s18 = scalar_select %p82_p6, %s630_s14, %s84_s6  }
  0x1b   : > { %s179_s24 = scalar_lea.hbm %s827_s2, %s392_s11  ;;  %s173_s27 = scalar_lea.vmem [#allocation8], %s391_s10 }
  0x1c   : > { %s181_s25 = sshll.u32 %s179_s24, 4  ;;  %s183_s28 = sshll.u32 %s173_s27, 4  ;;  %s182_s25 = int_to_ptr.hbm [resolvable:$true] %s181_s25  ;;  %s184_s28 = int_to_ptr.vmem [resolvable:$true] %s183_s28 }
  0x1d   : > { %p427_p10 = pnand %p436_p4, %p93_p9  ;;  %s170_s29 = scalar_lea.sflag [#allocation3], %s169_s9 }
  0x1e   : > { %192 = sbr.rel (%p721_p7) target bundleno = 63 (0x3f), region = 32 }
  0x1f   : > { %429 = dma.hbm_to_vmem [thread:$0]  (!%p427_p10), %s182_s25, 32, %s184_s28, %s170_s29  }
  0x23   : > { %605 = dma.done.wait (%p702_p1), [#allocation5], 16  }
  0x24   : > { %607 = vsyncadd (%p702_p1), [#allocation5], 4294967280 }
  0x25   : > { %609 = dma.done.wait (%p702_p1), [#allocation7], 16  }
  0x26   : > { %611 = vsyncadd (%p702_p1), [#allocation7], 4294967280  ;;  %s768_s30 = sand.u32 1, %s626_s13  }
  0x27   : > { %s396_s26 = sshll.u32 %s768_s30, 1  ;;  %s205_s4 = scalar_lea.sflag [#allocation3], %s768_s30 }
  0x28   : > { %s208_s6 = scalar_lea.vmem [#allocation8], %s396_s26 }
  0x29   : > { %613 = dma.done.wait (%p708_p3), %s205_s4, 32  }
  0x2a   : > { %615 = vsyncadd (%p708_p3), %s205_s4, 4294967264 }
  0x2b   : > { %214 = sfence }
  0x2c   : > { %s234_s8 = sld [smem:[#allocation2]]  ;;  %s405_s9 = smul.u32 6, %s768_s30  ;;  %v233_v0 = vld [vmem:[%s208_s6] sm:$0x3]  ;;  %v240_v1 = vlaneseq }
  0x2d   : > { %s237_s20 = sld [smem:[#allocation6]]  ;;  %s406_s24 = smul.u32 6, %s634_s15 }
  0x2e   : > { %s397_s10 = sld [smem:[#allocation2 + $0x1]]  ;;  %vm781_vm0 = vcmp.lt.s32.totalorder %v240_v1, 256  ;;  %s232_s28 = scalar_lea.vmem [#allocation9], %s405_s9 }
  0x2f   : > { %s398_s11 = sld [smem:[#allocation6 + $0x1]]  ;;  %s274_s21 = scalar_lea.hbm %s828_s3, %s406_s24 }
  0x30   : > { %s400_s19 = sld [smem:[#allocation2 + $0x2]]  ;;  %s275_s29 = sshll.u32 %s232_s28, 4  ;;  %s276_s29 = int_to_ptr.vmem [resolvable:$true] %s275_s29 }
  0x31   : > { %s401_s23 = sld [smem:[#allocation6 + $0x2]]  ;;  %s277_s15 = sshll.u32 %s274_s21, 4  ;;  %s278_s15 = int_to_ptr.hbm [resolvable:$true] %s277_s15 }
  0x32   : > { %v235_v2 = vstv %s234_s8  ;;  %s262_s26 = scalar_lea.sflag [#allocation4], %s768_s30  ;;  %s566_s4 = sshra.s32 %s278_s15, 4  ;;  %s567_s4 = int_to_ptr.hbm [resolvable:$true] %s566_s4 }
  0x33   : > { %v236_v3 = vmul.f32 %v235_v2, %v233_v0  ;;  %v238_v4 = vstv %s237_s20  ;;  %s568_s6 = scalar_lea.hbm %s567_s4, 6  ;;  %s572_s9 = scalar_lea.hbm %s828_s3, 12 }
  0x34   : > { %v246_v6 = vstv %s397_s10  ;;  %p569_p1 = scmp.ne.s32.totalorder %s567_s4, %s568_s6  ;;  %p573_p11 = scmp.lt.s32.totalorder %s567_s4, %s828_s3 }
  0x35   : > { %v239_v7 = vadd.f32 %v238_v4, %v236_v3  ;;  %v247_v8 = vmul.f32 %v246_v6, %v233_v0  ;;  %v249_v9 = vstv %s398_s11  ;;  %p574_p12 = scmp.lt.s32.totalorder %s572_s9, %s568_s6 }
  0x36   : > { %v254_v10 = vstv %s400_s19  ;;  %p570_p3 = pnand %p569_p1, %p740_p2 }
  0x37   : > { %244 = vst.msk [vmem:[%s232_s28] sm:$0x3] %vm781_vm0, %v239_v7  ;;  %v250_v11 = vadd.f32 %v249_v9, %v247_v8  ;;  %v255_v12 = vmul.f32 %v254_v10, %v233_v0  ;;  %v257_v13 = vstv %s401_s23  ;;  %p575_p13 = por %p574_p12, %p573_p11 }
  0x38   : > { %p571_p7 = pneg %p570_p3 }
  0x39   : > { %399 = vst.msk [vmem:[%s232_s28 + $0x2] sm:$0x3] %vm781_vm0, %v250_v11  ;;  %v258_v14 = vadd.f32 %v257_v13, %v255_v12 }
  0x3a   : > { %p576_p0 = pnand %p575_p13, %p571_p7 }
  0x3b   : > { %402 = vst.msk [vmem:[%s232_s28 + $0x4] sm:$0x3] %vm781_vm0, %v258_v14 }
  0x3c   : > { %579 = shalt.err (!%p576_p0)
}
  0x3d   : > { %s646_s30 = smov 32   ;;  %s647_s19 = smov 2  }
  0x3e   : > { %417 = dma.vmem_to_hbm [thread:$0]  (%p740_p2), %s276_s29, 96, %s278_s15, %s262_s26, %s646_s30, %s646_s30, %s647_s19  }
  0x3f PF: > { %s292_s23 = sand.u32 1, %s622_s12   ;;  %p431_p4 = pnand %p390_p8, %p713_p5 }
  0x40   : > { %s293_s24 = scalar_lea.sflag [#allocation4], %s292_s23 }
  0x41   : > { %p432_p6 = pneg %p431_p4 }
  0x43   : > { %617 = dma.done.wait (%p432_p6), %s293_s24, 96  }
  0x44   : > { %619 = vsyncadd (%p432_p6), %s293_s24, 4294967200  ;;  %s21_s17 = sadd.s32 1, %s642_s17   ;;  %s836_s12 = smov %s626_s13 }
  0x45   : > { %p18_p9 = scmp.ge.s32.totalorder %s21_s17, 4   ;;  %s837_s13 = smov %s630_s14 }
  0x46   : > { %s838_s14 = smov %s750_s18  ;;  %s839_s15 = smov %s638_s16 }
  0x47   : > { %s840_s16 = smov %s842_s5  ;;  %20 = sbr.rel (!%p18_p9) target bundleno = 8 (0x8), region = 88 }
  0x4c   :  { %299 = vsyncpa [#allocation3], 1 }
  0x4d   :  { %301 = vsyncpa [#allocation3 + $0x1], 1 }
  0x4e   :  { %302 = vsyncpa [#allocation4], 1 }
  0x4f   :  { %304 = vsyncpa [#allocation4 + $0x1], 1 }
  0x50   :  { %305 = vsyncpa [#allocation5], 1 }
  0x51   :  { %307 = vsyncpa [#allocation5 + $0x1], 1 }
  0x52   :  { %308 = vsyncpa [#allocation7], 1 }

</bundles_post_ra>
